<compile_context>
chip_gen: v5e
topology: v5e:2x2
jax: 0.10.0
libtpu: 0.0.40
codegen_flags: <defaults>
</compile_context>

<pallas_src>
import functools

import jax
import jax.numpy as jnp
from jax.experimental import pallas as pl
from jax.experimental.pallas import tpu as pltpu

# ----------------------- config (small T5) ----------------------------------
D_MODEL = 32        # config.d_model
D_FF = 128          # config.d_ff
MATMUL_DTYPE = jnp.bfloat16   # MXU operand dtype; accumulation stays f32
# TODO(synk): dropout is identity here (eval mode); training-mode dropout not implemented.


def _ffn_kernel(x_ref, z_ref, wi_ref, wo_ref, out_ref):
    # x_ref: (TM, D)   z_ref: (1, F)   wi_ref: (D, F)   wo_ref: (F, D)
    x = x_ref[...].astype(MATMUL_DTYPE)
    wi = wi_ref[...].astype(MATMUL_DTYPE)
    wo = wo_ref[...].astype(MATMUL_DTYPE)

    # wi projection (f32 accumulation on the MXU).
    h = jnp.dot(x, wi, preferred_element_type=jnp.float32)         # (TM, F)
    # ReLU + optional intermediate_z scaling in f32 on the VPU.
    h = jnp.maximum(h, 0.0)
    h = h * z_ref[...]                                              # broadcast (1, F)
    # wo projection.
    out = jnp.dot(h.astype(MATMUL_DTYPE), wo,
                  preferred_element_type=jnp.float32)               # (TM, D)
    out_ref[...] = out.astype(out_ref.dtype)


def _choose_row_tile(m_padded, row_tile_cap):
    """Largest tile <= cap that divides the padded row count (multiple of 8)."""
    if m_padded <= row_tile_cap:
        return m_padded
    for cand in (512, 256, 128, 64, 32, 16, 8):
        if cand <= row_tile_cap and m_padded % cand == 0:
            return cand
    return m_padded


def nash_t5_dense_relu_dense(hidden_states, wi, wo, intermediate_z=None,
                             *, row_tile=256):
    """hidden_states: (..., d_model); wi: (d_model, d_ff); wo: (d_ff, d_model).

    intermediate_z: optional (d_ff,) (or broadcastable) pruning mask.
    """
    orig_shape = hidden_states.shape
    D = orig_shape[-1]
    F = wi.shape[1]

    # Flatten batch*seq into one large row dimension (big-tile lever).
    x = hidden_states.reshape(-1, D)
    M = x.shape[0]

    # Pad rows to a multiple of 8 sublanes so the row tile is always legal.
    pad = (-M) % 8
    if pad:
        x = jnp.concatenate([x, jnp.zeros((pad, D), x.dtype)], axis=0)
    Mp = x.shape[0]
    tm = _choose_row_tile(Mp, row_tile)

    if intermediate_z is None:
        z = jnp.ones((1, F), jnp.float32)
    else:
        z = jnp.asarray(intermediate_z, jnp.float32).reshape(1, F)

    out_flat = pl.pallas_call(
        _ffn_kernel,
        out_shape=jax.ShapeDtypeStruct((Mp, D), hidden_states.dtype),
        grid_spec=pl.GridSpec(
            grid=(Mp // tm,),
            in_specs=[
                pl.BlockSpec((tm, D), lambda i: (i, 0)),   # activations (tiled rows)
                pl.BlockSpec((1, F), lambda i: (0, 0)),    # intermediate_z (resident)
                pl.BlockSpec((D, F), lambda i: (0, 0)),    # Wi (resident)
                pl.BlockSpec((F, D), lambda i: (0, 0)),    # Wo (resident)
            ],
            out_specs=pl.BlockSpec((tm, D), lambda i: (i, 0)),
        ),
        compiler_params=pltpu.CompilerParams(
            dimension_semantics=("parallel",)),
    )(x, z, wi, wo)

    if pad:
        out_flat = out_flat[:M]
    return out_flat.reshape(orig_shape)


def _reference(hidden_states, wi, wo, intermediate_z=None):
    """Pure-JAX reference mirroring the PyTorch forward (eval mode)."""
    h = hidden_states @ wi
    h = jnp.maximum(h, 0.0)
    if intermediate_z is not None:
        h = h * intermediate_z
    return h @ wo


def init_params(key):
    k_wi, k_wo = jax.random.split(key, 2)
    scale = 0.05
    return {
        "wi": scale * jax.random.normal(k_wi, (D_MODEL, D_FF), jnp.float32),
        "wo": scale * jax.random.normal(k_wo, (D_FF, D_MODEL), jnp.float32),
    }


if __name__ == "__main__":
    key = jax.random.PRNGKey(0)
    k_x, k_z, k_p = jax.random.split(key, 3)

    B, S = 2, 8
    hidden_states = jax.random.normal(k_x, (B, S, D_MODEL), jnp.float32)
    intermediate_z = jax.random.uniform(k_z, (D_FF,), jnp.float32)
    params = init_params(k_p)

    # With intermediate_z.
    out = nash_t5_dense_relu_dense(hidden_states, params["wi"], params["wo"],
                                   intermediate_z)
    out = jax.block_until_ready(out)
    ref = _reference(hidden_states, params["wi"], params["wo"], intermediate_z)
    assert out.shape == (B, S, D_MODEL)
    assert jnp.allclose(out, ref, rtol=2e-2, atol=2e-2), "mismatch vs reference (with z)"

    # Without intermediate_z (None path).
    out_nz = nash_t5_dense_relu_dense(hidden_states, params["wi"], params["wo"], None)
    out_nz = jax.block_until_ready(out_nz)
    ref_nz = _reference(hidden_states, params["wi"], params["wo"], None)
    assert jnp.allclose(out_nz, ref_nz, rtol=2e-2, atol=2e-2), "mismatch vs reference (no z)"

    print("KERNEL_OK")
</pallas_src>

<mosaic_0001>
module attributes {stable_mosaic.version = 11 : i64} {
  func.func @_ffn_kernel(%arg0: i32, %arg1: memref<16x32xf32, #tpu.memory_space<vmem>>, %arg2: memref<1x128xf32, #tpu.memory_space<vmem>>, %arg3: memref<32x128xf32, #tpu.memory_space<vmem>>, %arg4: memref<128x32xf32, #tpu.memory_space<vmem>>, %arg5: memref<16x32xf32, #tpu.memory_space<vmem>>) attributes {dimension_semantics = [#tpu.dimension_semantics<parallel>], iteration_bounds = array<i64: 1>, scalar_prefetch = 0 : i64, scratch_operands = 0 : i64, tpu.core_type = #tpu.core_type<tc>, window_params = [{transform_indices = @transform_0, window_bounds = array<i64: 16, 32>}, {pipeline_mode = #tpu.pipeline_mode<synchronous>, transform_indices = @transform_1, window_bounds = array<i64: 1, 128>}, {pipeline_mode = #tpu.pipeline_mode<synchronous>, transform_indices = @transform_2, window_bounds = array<i64: 32, 128>}, {pipeline_mode = #tpu.pipeline_mode<synchronous>, transform_indices = @transform_3, window_bounds = array<i64: 128, 32>}, {transform_indices = @transform_4, window_bounds = array<i64: 16, 32>}]} {
    %c0 = arith.constant 0 : index
    %c0_0 = arith.constant 0 : index
    %0 = vector.load %arg1[%c0, %c0_0] : memref<16x32xf32, #tpu.memory_space<vmem>>, vector<16x32xf32>
    %1 = arith.truncf %0 : vector<16x32xf32> to vector<16x32xbf16>
    %c0_1 = arith.constant 0 : index
    %c0_2 = arith.constant 0 : index
    %2 = vector.load %arg3[%c0_1, %c0_2] : memref<32x128xf32, #tpu.memory_space<vmem>>, vector<32x128xf32>
    %3 = arith.truncf %2 : vector<32x128xf32> to vector<32x128xbf16>
    %c0_3 = arith.constant 0 : index
    %c0_4 = arith.constant 0 : index
    %4 = vector.load %arg4[%c0_3, %c0_4] : memref<128x32xf32, #tpu.memory_space<vmem>>, vector<128x32xf32>
    %5 = arith.truncf %4 : vector<128x32xf32> to vector<128x32xbf16>
    %cst = arith.constant dense<0.000000e+00> : vector<16x128xf32>
    %6 = tpu.matmul %1, %3, %cst {dimension_numbers = #tpu.dot_dimension_numbers<[1], [0], [0], [1], [0, 0, 1, 1], [], []>} : vector<16x32xbf16>, vector<32x128xbf16>, vector<16x128xf32> -> vector<16x128xf32>
    %cst_5 = arith.constant 0.000000e+00 : f32
    %7 = vector.broadcast %cst_5 : f32 to vector<16x128xf32>
    %8 = arith.maximumf %6, %7 : vector<16x128xf32>
    %c0_6 = arith.constant 0 : index
    %c0_7 = arith.constant 0 : index
    %9 = vector.load %arg2[%c0_6, %c0_7] : memref<1x128xf32, #tpu.memory_space<vmem>>, vector<1x128xf32>
    %10 = vector.broadcast %9 : vector<1x128xf32> to vector<16x128xf32>
    %11 = arith.mulf %8, %10 : vector<16x128xf32>
    %12 = arith.truncf %11 : vector<16x128xf32> to vector<16x128xbf16>
    %cst_8 = arith.constant dense<0.000000e+00> : vector<16x32xf32>
    %13 = tpu.matmul %12, %5, %cst_8 {dimension_numbers = #tpu.dot_dimension_numbers<[1], [0], [0], [1], [0, 0, 1, 1], [], []>} : vector<16x128xbf16>, vector<128x32xbf16>, vector<16x32xf32> -> vector<16x32xf32>
    %c0_9 = arith.constant 0 : index
    %c0_10 = arith.constant 0 : index
    %14 = vector.load %arg5[%c0_9, %c0_10] : memref<16x32xf32, #tpu.memory_space<vmem>>, vector<16x32xf32>
    tpu.vector_store %arg5[%c0_9, %c0_10], %13 {strides = array<i32>} : memref<16x32xf32, #tpu.memory_space<vmem>>, vector<16x32xf32>,
    return
  }
  func.func @transform_0(%arg0: i32) -> (i32, i32) {
    %c0_i32 = arith.constant 0 : i32
    %c0_i32_0 = arith.constant 0 : i32
    return %arg0, %c0_i32 : i32, i32
  }
  func.func @transform_1(%arg0: i32) -> (i32, i32) {
    %c0_i32 = arith.constant 0 : i32
    %c0_i32_0 = arith.constant 0 : i32
    %c0_i32_1 = arith.constant 0 : i32
    return %c0_i32, %c0_i32_0 : i32, i32
  }
  func.func @transform_2(%arg0: i32) -> (i32, i32) {
    %c0_i32 = arith.constant 0 : i32
    %c0_i32_0 = arith.constant 0 : i32
    %c0_i32_1 = arith.constant 0 : i32
    return %c0_i32, %c0_i32_0 : i32, i32
  }
  func.func @transform_3(%arg0: i32) -> (i32, i32) {
    %c0_i32 = arith.constant 0 : i32
    %c0_i32_0 = arith.constant 0 : i32
    %c0_i32_1 = arith.constant 0 : i32
    return %c0_i32, %c0_i32_0 : i32, i32
  }
  func.func @transform_4(%arg0: i32) -> (i32, i32) {
    %c0_i32 = arith.constant 0 : i32
    %c0_i32_0 = arith.constant 0 : i32
    return %arg0, %c0_i32 : i32, i32
  }
}

</mosaic_0001>

<bundles_post_ra>
// kernel: tpu_custom_call.1
= control target key start
LH: loop header
LB: loop body
LE: loop exit
PB: predicated region body
PF: predicated region fallthrough
CT: control target
= control target key end

     0   :  { %s247_s0 = inlined_call_operand.vmem [shape: f32[16,32], index: 0, kind: input, shape index: {}]   ;;  %s248_s1 = inlined_call_operand.vmem [shape: f32[1,128], index: 1, kind: input, shape index: {}]   ;;  %s249_s2 = inlined_call_operand.vmem [shape: f32[32,128], index: 2, kind: input, shape index: {}]   ;;  %s250_s3 = inlined_call_operand.vmem [shape: f32[128,32], index: 3, kind: input, shape index: {}]   ;;  %s251_s4 = inlined_call_operand.hbm [shape: f32[16,32], index: 4, kind: output, shape index: {}]  }
   0x1   :  { %v24_v0 = vld [vmem:[%s249_s2 + $0x10] sm:$0xff]  ;;  %v25_v1 = vld [vmem:[%s249_s2 + $0x18] sm:$0xff]  ;;  %v22_v2 = vld [vmem:[%s249_s2] sm:$0xff] }
   0x2   :  { %v27_v3 = vpack.c.bf16 %v25_v1, %v24_v0  ;;  %v23_v4 = vld [vmem:[%s249_s2 + $0x8] sm:$0xff]  ;;  %v42_v5 = vld [vmem:[%s250_s3 + $0x70] sm:$0xff]  ;;  %v43_v6 = vld [vmem:[%s250_s3 + $0x78] sm:$0xff] }
   0x3   :  { %v40_v7 = vld [vmem:[%s250_s3 + $0x60] sm:$0xff]  ;;  %v26_v8 = vpack.c.bf16 %v23_v4, %v22_v2  ;;  %v20_v10 = vld [vmem:[%s247_s0 + $0x8] sm:$0xff]  ;;  %v51_v11 = vpack.c.bf16 %v43_v6, %v42_v5 }
   0x4   :  { %62 = vmatpush.bf16.msra.mxu0 %v27_v3  ;;  %v19_v9 = vld [vmem:[%s247_s0] sm:$0xff]  ;;  %v41_v12 = vld [vmem:[%s250_s3 + $0x68] sm:$0xff] }
   0x5   :  { %79 = vmatpush.bf16.msra.mxu1 %v51_v11  ;;  %v50_v13 = vpack.c.bf16 %v41_v12, %v40_v7 }
   0x6   :  { %9 = vsyncpa [#allocation3], 0  ;;  %v21_v14 = vpack.c.bf16 %v20_v10, %v19_v9  ;;  %v38_v15 = vld [vmem:[%s250_s3 + $0x50] sm:$0xff]  ;;  %v39_v16 = vld [vmem:[%s250_s3 + $0x58] sm:$0xff]  ;;  %vm52_vm0 = vcmask 261120   ;;  %s144_s6 = smov [#allocation2]  }
   0x7   :  { %v49_v17 = vpack.c.bf16 %v39_v16, %v38_v15  ;;  %v36_v18 = vld [vmem:[%s250_s3 + $0x40] sm:$0xff]  ;;  %v37_v19 = vld [vmem:[%s250_s3 + $0x48] sm:$0xff]  ;;  %v34_v21 = vld [vmem:[%s250_s3 + $0x30] sm:$0xff]  ;;  %s99_s7 = sshll.u32 %s144_s6, 4  ;;  %s101_s9 = sshll.u32 %s251_s4, 4  ;;  %s100_s7 = int_to_ptr.vmem [resolvable:$true] %s99_s7  ;;  %s102_s9 = int_to_ptr.hbm [resolvable:$true] %s101_s9 }
   0x8   :  { %63 = vmatpush.bf16.msra.mxu0 %v26_v8  ;;  %v48_v20 = vpack.c.bf16 %v37_v19, %v36_v18  ;;  %v35_v22 = vld [vmem:[%s250_s3 + $0x38] sm:$0xff]  ;;  %v32_v24 = vld [vmem:[%s250_s3 + $0x20] sm:$0xff]  ;;  %v33_v25 = vld [vmem:[%s250_s3 + $0x28] sm:$0xff]  ;;  %s146_s10 = smov 8  }
   0x9   :  { %80 = vmatpush.bf16.msra.mxu1 %v50_v13  ;;  %v47_v23 = vpack.c.bf16 %v35_v22, %v34_v21  ;;  %v46_v26 = vpack.c.bf16 %v33_v25, %v32_v24  ;;  %v30_v27 = vld [vmem:[%s250_s3 + $0x10] sm:$0xff]  ;;  %v31_v28 = vld [vmem:[%s250_s3 + $0x18] sm:$0xff]  ;;  %v28_v30 = vld [vmem:[%s250_s3] sm:$0xff] }
   0xa   :  { %v45_v29 = vpack.c.bf16 %v31_v28, %v30_v27  ;;  %v29_v31 = vld [vmem:[%s250_s3 + $0x8] sm:$0xff]  ;;  %v117_v35 = vld [vmem:[%s248_s1] ss:$0 sm:$0xff]  ;;  %s145_s1 = smov 128  }
   0xb   :  { %113 = vmatmul.msk.bf16.vlgmr.msra.gmra.mxu0 %vm52_vm0, %v21_v14  ;;  %v44_v32 = vpack.c.bf16 %v29_v31, %v28_v30 }
   0xd   :  { %81 = vmatpush.bf16.msra.mxu1 %v49_v17 }
  0x11   :  { %82 = vmatpush.bf16.msra.mxu1 %v48_v20 }
  0x15   :  { %83 = vmatpush.bf16.msra.mxu1 %v47_v23 }
  0x19   :  { %84 = vmatpush.bf16.msra.mxu1 %v46_v26 }
  0x1d   :  { %85 = vmatpush.bf16.msra.mxu1 %v45_v29 }
  0x21   :  { %86 = vmatpush.bf16.msra.mxu1 %v44_v32 }
  0x88   :  { %v65_v33 = vpop.f32.mrf.mxu0 }
  0x89   :  { %v70_v34 = vmax.f32 %v65_v33, 0.0 }
  0x8b   :  { %v76_v38 = vmul.f32 %v117_v35, %v70_v34 }
  0x90   :  { %v67_v36 = vpop.f32.mrf.mxu0 }
  0x91   :  { %v71_v37 = vmax.f32 %v67_v36, 0.0 }
  0x93   :  { %v77_v39 = vmul.f32 %v117_v35, %v71_v37 }
  0x95   :  { %v78_v40 = vpack.c.bf16 %v77_v39, %v76_v38 }
  0x97   :  { %87 = vmatmul.bf16.vlgmr.msra.gmra.mxu1 %v78_v40 }
 0x114   :  { %v88_v41 = vpop.f32.mrf.mxu1 }
 0x115   :  { %93 = vst.msk [vmem:[#allocation2] sm:$0xff] %vm52_vm0, %v88_v41 }
 0x11c   :  { %v90_v42 = vpop.f32.mrf.mxu1 }
 0x11d   :  { %94 = vst.msk [vmem:[#allocation2 + $0x8] sm:$0xff] %vm52_vm0, %v90_v42 }
 0x11e   :  { %107 = dma.vmem_to_hbm [thread:$0]  %s100_s7, 256, %s102_s9, [#allocation3], %s145_s1, %s145_s1, %s146_s10  }
 0x11f   :  { %142 = dma.done.wait [#allocation3], 256  }
 0x120   :  { %143 = vsyncadd [#allocation3], 4294967040 }
 0x121   :  { %112 = vsyncpa [#allocation3], 1 }

</bundles_post_ra>
